<compile_context>
chip_gen: v7x
topology: tpu7x:2x2x1
jax: 0.10.0
libtpu: 0.0.40
codegen_flags: <defaults>
</compile_context>

<pallas_src>
import jax
import jax.numpy as jnp
from jax.experimental import pallas as pl
from jax.experimental.pallas import tpu as pltpu


# ----------------------------- configuration -----------------------------
N_AGENTS = 4
CENTRAL_ACTION_EMBED = 1
ACT_DIM = N_AGENTS * CENTRAL_ACTION_EMBED          # 4
STATE_DIM = 32                                     # int(np.prod(state_shape))
EMBED_DIM = 128                                    # central_mixing_embed_dim
INPUT_DIM = STATE_DIM + ACT_DIM                    # 36  ([states | agent_qs])

TILE_N = 1024   # max rows per grid step (adaptive; see wrapper)


def _round_up(x, m):
    return (x + m - 1) // m * m


# ------------------------------- kernel ----------------------------------
def _qmix_central_ff_kernel(
    x_ref,        # (tile_n, INPUT_DIM) f32  packed [states | agent_qs] tile
    wf_ref,       # (INPUT_DIM, 2*EMBED) bf16  fused first layer [w1 | vw1;0]
    bf_ref,       # (1, 2*EMBED) f32           fused first bias  [b1 | vb1]
    w2_ref, b2_ref,   # (EMBED, EMBED) bf16, (1, EMBED) f32
    w3_ref, b3_ref,   # (EMBED, EMBED) bf16, (1, EMBED) f32
    w4_row_ref,   # (1, EMBED) f32             final advantage projection (row)
    vw2_row_ref,  # (1, EMBED) f32             final value projection (row)
    b_out_ref,    # (1,) f32 in SMEM           b4 + vb2 folded into one scalar
    out_ref,      # (1, tile_n) f32            lane-dense output row
):
    # Fused first layer of both streams (bf16 MXU, f32 accumulation):
    #   y = [s|a] @ [w1 | (vw1;0)] + [b1 | vb1]
    xb = x_ref[...].astype(jnp.bfloat16)
    y = jnp.dot(xb, wf_ref[...], preferred_element_type=jnp.float32)
    y = jnp.maximum(y + bf_ref[...], 0.0)          # (tile_n, 256) f32

    h = y[:, :EMBED_DIM]                           # advantage stream after layer 1
    v = y[:, EMBED_DIM:]                           # value stream (its only hidden layer)

    # Advantage-stream hidden layers (bf16 ExE MXU matmuls, f32 bias+ReLU).
    h = jnp.maximum(
        jnp.dot(h.astype(jnp.bfloat16), w2_ref[...],
                preferred_element_type=jnp.float32) + b2_ref[...], 0.0)
    h = jnp.maximum(
        jnp.dot(h.astype(jnp.bfloat16), w3_ref[...],
                preferred_element_type=jnp.float32) + b3_ref[...], 0.0)

    # Final E->1 projections on the VPU (f32), then a lane-dense epilogue:
    # transpose (tile_n, 128) -> (128, tile_n) on the (otherwise idle) XLU and
    # reduce over sublanes, so the store is one dense (1, tile_n) row instead
    # of tile_n/8 masked vst.msk partial stores.
    g = h * w4_row_ref[...] + v * vw2_row_ref[...]           # (tile_n, EMBED)
    out_ref[...] = jnp.sum(g.T, axis=0, keepdims=True) + b_out_ref[0]


# ------------------------- kernel parameter prep ---------------------------
def _prepare_kernel_params(params):
    """Repack PyTorch-style params into the fused / bf16 layout the kernel uses."""
    (w1, b1, w2, b2, w3, b3, w4, b4, vw1, vb1, vw2, vb2) = params
    f32 = jnp.float32
    # Fused first layer: cols [0:128] = advantage layer-1 (consumes [s|a]),
    # cols [128:256] = value layer-1 (consumes s only -> zero rows for a).
    vw1_pad = jnp.concatenate(
        [vw1.astype(f32), jnp.zeros((ACT_DIM, EMBED_DIM), f32)], axis=0)   # (36, 128)
    w_first = jnp.concatenate([w1.astype(f32), vw1_pad], axis=1)           # (36, 256)
    b_first = jnp.concatenate([b1, vb1], axis=1).astype(f32)               # (1, 256)

    vmem_params = (
        w_first.astype(jnp.bfloat16),
        b_first,
        w2.astype(jnp.bfloat16), b2.astype(f32),
        w3.astype(jnp.bfloat16), b3.astype(f32),
        w4.reshape(1, EMBED_DIM).astype(f32),
        vw2.reshape(1, EMBED_DIM).astype(f32),
    )
    b_out = (b4 + vb2).reshape(1).astype(f32)                              # SMEM scalar
    return vmem_params, b_out


# ------------------------------- wrapper ----------------------------------
def qmix_central_ff(agent_qs, states, params, tile_n=TILE_N):
    """agent_qs: (bs, T, n_agents*cae), states: (bs, T, state_dim) -> (bs, T, 1)."""
    bs = agent_qs.shape[0]
    s2 = states.reshape(-1, STATE_DIM).astype(jnp.float32)
    a2 = agent_qs.reshape(-1, ACT_DIM).astype(jnp.float32)
    # Same ordering as the PyTorch module: inputs = th.cat([states, agent_qs], dim=1).
    x2 = jnp.concatenate([s2, a2], axis=1)                    # (N, 36)
    n_rows = x2.shape[0]

    # Adaptive tile size:
    #  * multiple of 128 (lane-dense output rows),
    #  * no bigger than the padded problem -> tiny batches don't pad to 1024,
    #  * clamped so the row grid has >= 2 tiles when possible (v7x: 2 TCs).
    tile_n = _round_up(max(int(tile_n), 128), 128)
    tile_n = min(tile_n, _round_up(n_rows, 128))
    tile_n = max(128, min(tile_n, _round_up(pl.cdiv(n_rows, 2), 128)))
    n_tiles = pl.cdiv(n_rows, tile_n)
    n_pad = n_tiles * tile_n
    if n_pad != n_rows:
        x2 = jnp.pad(x2, ((0, n_pad - n_rows), (0, 0)))

    vmem_params, b_out = _prepare_kernel_params(params)

    # Weights/biases: constant index maps -> resident in VMEM across grid steps.
    const_specs = [pl.BlockSpec(p.shape, lambda i: (0, 0)) for p in vmem_params]

    out = pl.pallas_call(
        _qmix_central_ff_kernel,
        out_shape=jax.ShapeDtypeStruct((n_tiles, tile_n), jnp.float32),
        grid=(n_tiles,),
        in_specs=[pl.BlockSpec((tile_n, INPUT_DIM), lambda i: (i, 0))]
                 + const_specs
                 + [pl.BlockSpec(memory_space=pltpu.MemorySpace.SMEM)],
        out_specs=pl.BlockSpec((1, tile_n), lambda i: (i, 0)),
        compiler_params=pltpu.CompilerParams(
            dimension_semantics=("parallel",)),
    )(x2, *vmem_params, b_out)

    return out.reshape(-1)[:n_rows].reshape(bs, -1, 1)


# --------------------------- parameter setup -------------------------------
def init_params(key):
    """Deterministic init mimicking PyTorch Linear default (uniform ±1/sqrt(fan_in))."""
    def linear(key, fan_in, fan_out):
        kw, kb = jax.random.split(key)
        bound = 1.0 / jnp.sqrt(jnp.float32(fan_in))
        w = jax.random.uniform(kw, (fan_in, fan_out), jnp.float32, -bound, bound)
        b = jax.random.uniform(kb, (1, fan_out), jnp.float32, -bound, bound)
        return w, b

    keys = jax.random.split(key, 6)
    w1, b1 = linear(keys[0], INPUT_DIM, EMBED_DIM)
    w2, b2 = linear(keys[1], EMBED_DIM, EMBED_DIM)
    w3, b3 = linear(keys[2], EMBED_DIM, EMBED_DIM)
    w4, b4 = linear(keys[3], EMBED_DIM, 1)
    vw1, vb1 = linear(keys[4], STATE_DIM, EMBED_DIM)
    vw2, vb2 = linear(keys[5], EMBED_DIM, 1)
    return (w1, b1, w2, b2, w3, b3, w4, b4, vw1, vb1, vw2, vb2)


# ---------------------------- reference (JAX, f32) --------------------------
def reference(agent_qs, states, params):
    (w1, b1, w2, b2, w3, b3, w4, b4, vw1, vb1, vw2, vb2) = params
    bs = agent_qs.shape[0]
    s = states.reshape(-1, STATE_DIM)
    a = agent_qs.reshape(-1, ACT_DIM)
    x = jnp.concatenate([s, a], axis=1)
    h = jnp.maximum(x @ w1 + b1, 0.0)
    h = jnp.maximum(h @ w2 + b2, 0.0)
    h = jnp.maximum(h @ w3 + b3, 0.0)
    advs = h @ w4 + b4
    v = jnp.maximum(s @ vw1 + vb1, 0.0)
    vs = v @ vw2 + vb2
    return (advs + vs).reshape(bs, -1, 1)


# --------------------------------- main -------------------------------------
if __name__ == "__main__":
    key = jax.random.PRNGKey(0)
    k_params, k_q, k_s = jax.random.split(key, 3)

    bs, T = 2, 8
    agent_qs = jax.random.normal(k_q, (bs, T, ACT_DIM), jnp.float32)
    states = jax.random.normal(k_s, (bs, T, STATE_DIM), jnp.float32)

    params = init_params(k_params)

    q_tot = qmix_central_ff(agent_qs, states, params)
    q_tot = jax.block_until_ready(q_tot)

    q_ref = reference(agent_qs, states, params)
    assert q_tot.shape == (bs, T, 1), q_tot.shape
    # Tolerance relaxed vs. the pure-f32 version: the kernel feeds the MXU
    # bf16 operands (f32 accumulation), so ~1e-3-level deviations are expected.
    assert jnp.allclose(q_tot, q_ref, atol=2e-2, rtol=2e-2), "mismatch vs reference"

    print("KERNEL_OK")
</pallas_src>

<mosaic_0001>
module attributes {stable_mosaic.version = 11 : i64} {
  func.func @_qmix_central_ff_kernel(%arg0: i32, %arg1: memref<128x36xf32, #tpu.memory_space<vmem>>, %arg2: memref<36x256xbf16, #tpu.memory_space<vmem>>, %arg3: memref<1x256xf32, #tpu.memory_space<vmem>>, %arg4: memref<128x128xbf16, #tpu.memory_space<vmem>>, %arg5: memref<1x128xf32, #tpu.memory_space<vmem>>, %arg6: memref<128x128xbf16, #tpu.memory_space<vmem>>, %arg7: memref<1x128xf32, #tpu.memory_space<vmem>>, %arg8: memref<1x128xf32, #tpu.memory_space<vmem>>, %arg9: memref<1x128xf32, #tpu.memory_space<vmem>>, %arg10: memref<1xf32, #tpu.memory_space<smem>>, %arg11: memref<1x128xf32, #tpu.memory_space<vmem>>) attributes {dimension_semantics = [#tpu.dimension_semantics<parallel>], iteration_bounds = array<i64: 1>, scalar_prefetch = 0 : i64, scratch_operands = 0 : i64, tpu.core_type = #tpu.core_type<tc>, window_params = [{transform_indices = @transform_0, window_bounds = array<i64: 128, 36>}, {pipeline_mode = #tpu.pipeline_mode<synchronous>, transform_indices = @transform_1, window_bounds = array<i64: 36, 256>}, {pipeline_mode = #tpu.pipeline_mode<synchronous>, transform_indices = @transform_2, window_bounds = array<i64: 1, 256>}, {pipeline_mode = #tpu.pipeline_mode<synchronous>, transform_indices = @transform_3, window_bounds = array<i64: 128, 128>}, {pipeline_mode = #tpu.pipeline_mode<synchronous>, transform_indices = @transform_4, window_bounds = array<i64: 1, 128>}, {pipeline_mode = #tpu.pipeline_mode<synchronous>, transform_indices = @transform_5, window_bounds = array<i64: 128, 128>}, {pipeline_mode = #tpu.pipeline_mode<synchronous>, transform_indices = @transform_6, window_bounds = array<i64: 1, 128>}, {pipeline_mode = #tpu.pipeline_mode<synchronous>, transform_indices = @transform_7, window_bounds = array<i64: 1, 128>}, {pipeline_mode = #tpu.pipeline_mode<synchronous>, transform_indices = @transform_8, window_bounds = array<i64: 1, 128>}, {transform_indices = @transform_9, window_bounds = array<i64: 1>}, {transform_indices = @transform_10, window_bounds = array<i64: 1, 128>}]} {
    %c0 = arith.constant 0 : index
    %c0_0 = arith.constant 0 : index
    %0 = vector.load %arg1[%c0, %c0_0] : memref<128x36xf32, #tpu.memory_space<vmem>>, vector<128x36xf32>
    %1 = arith.truncf %0 : vector<128x36xf32> to vector<128x36xbf16>
    %c0_1 = arith.constant 0 : index
    %c0_2 = arith.constant 0 : index
    %2 = vector.load %arg2[%c0_1, %c0_2] : memref<36x256xbf16, #tpu.memory_space<vmem>>, vector<36x256xbf16>
    %cst = arith.constant dense<0.000000e+00> : vector<128x256xf32>
    %3 = tpu.matmul %1, %2, %cst {dimension_numbers = #tpu.dot_dimension_numbers<[1], [0], [0], [1], [0, 0, 1, 1], [], []>} : vector<128x36xbf16>, vector<36x256xbf16>, vector<128x256xf32> -> vector<128x256xf32>
    %c0_3 = arith.constant 0 : index
    %c0_4 = arith.constant 0 : index
    %4 = vector.load %arg3[%c0_3, %c0_4] : memref<1x256xf32, #tpu.memory_space<vmem>>, vector<1x256xf32>
    %5 = vector.broadcast %4 : vector<1x256xf32> to vector<128x256xf32>
    %6 = arith.addf %3, %5 : vector<128x256xf32>
    %cst_5 = arith.constant 0.000000e+00 : f32
    %7 = vector.broadcast %cst_5 : f32 to vector<128x256xf32>
    %8 = arith.maximumf %6, %7 : vector<128x256xf32>
    %9 = vector.extract_strided_slice %8 {offsets = [0, 0], sizes = [128, 128], strides = [1, 1]} : vector<128x256xf32> to vector<128x128xf32>
    %10 = vector.extract_strided_slice %8 {offsets = [0, 128], sizes = [128, 128], strides = [1, 1]} : vector<128x256xf32> to vector<128x128xf32>
    %11 = arith.truncf %9 : vector<128x128xf32> to vector<128x128xbf16>
    %c0_6 = arith.constant 0 : index
    %c0_7 = arith.constant 0 : index
    %12 = vector.load %arg4[%c0_6, %c0_7] : memref<128x128xbf16, #tpu.memory_space<vmem>>, vector<128x128xbf16>
    %cst_8 = arith.constant dense<0.000000e+00> : vector<128x128xf32>
    %13 = tpu.matmul %11, %12, %cst_8 {dimension_numbers = #tpu.dot_dimension_numbers<[1], [0], [0], [1], [0, 0, 1, 1], [], []>} : vector<128x128xbf16>, vector<128x128xbf16>, vector<128x128xf32> -> vector<128x128xf32>
    %c0_9 = arith.constant 0 : index
    %c0_10 = arith.constant 0 : index
    %14 = vector.load %arg5[%c0_9, %c0_10] : memref<1x128xf32, #tpu.memory_space<vmem>>, vector<1x128xf32>
    %15 = vector.broadcast %14 : vector<1x128xf32> to vector<128x128xf32>
    %16 = arith.addf %13, %15 : vector<128x128xf32>
    %cst_11 = arith.constant 0.000000e+00 : f32
    %17 = vector.broadcast %cst_11 : f32 to vector<128x128xf32>
    %18 = arith.maximumf %16, %17 : vector<128x128xf32>
    %19 = arith.truncf %18 : vector<128x128xf32> to vector<128x128xbf16>
    %c0_12 = arith.constant 0 : index
    %c0_13 = arith.constant 0 : index
    %20 = vector.load %arg6[%c0_12, %c0_13] : memref<128x128xbf16, #tpu.memory_space<vmem>>, vector<128x128xbf16>
    %cst_14 = arith.constant dense<0.000000e+00> : vector<128x128xf32>
    %21 = tpu.matmul %19, %20, %cst_14 {dimension_numbers = #tpu.dot_dimension_numbers<[1], [0], [0], [1], [0, 0, 1, 1], [], []>} : vector<128x128xbf16>, vector<128x128xbf16>, vector<128x128xf32> -> vector<128x128xf32>
    %c0_15 = arith.constant 0 : index
    %c0_16 = arith.constant 0 : index
    %22 = vector.load %arg7[%c0_15, %c0_16] : memref<1x128xf32, #tpu.memory_space<vmem>>, vector<1x128xf32>
    %23 = vector.broadcast %22 : vector<1x128xf32> to vector<128x128xf32>
    %24 = arith.addf %21, %23 : vector<128x128xf32>
    %cst_17 = arith.constant 0.000000e+00 : f32
    %25 = vector.broadcast %cst_17 : f32 to vector<128x128xf32>
    %26 = arith.maximumf %24, %25 : vector<128x128xf32>
    %c0_18 = arith.constant 0 : index
    %c0_19 = arith.constant 0 : index
    %27 = vector.load %arg8[%c0_18, %c0_19] : memref<1x128xf32, #tpu.memory_space<vmem>>, vector<1x128xf32>
    %28 = vector.broadcast %27 : vector<1x128xf32> to vector<128x128xf32>
    %29 = arith.mulf %26, %28 : vector<128x128xf32>
    %c0_20 = arith.constant 0 : index
    %c0_21 = arith.constant 0 : index
    %30 = vector.load %arg9[%c0_20, %c0_21] : memref<1x128xf32, #tpu.memory_space<vmem>>, vector<1x128xf32>
    %31 = vector.broadcast %30 : vector<1x128xf32> to vector<128x128xf32>
    %32 = arith.mulf %10, %31 : vector<128x128xf32>
    %33 = arith.addf %29, %32 : vector<128x128xf32>
    %34 = tpu.transpose %33, [1, 0] : vector<128x128xf32> -> vector<128x128xf32>
    %cst_22 = arith.constant dense<0.000000e+00> : vector<128xf32>
    %35 = vector.multi_reduction <add>, %34, %cst_22 [0] : vector<128x128xf32> to vector<128xf32>
    %36 = vector.shape_cast %35 : vector<128xf32> to vector<1x128xf32>
    %c0_23 = arith.constant 0 : index
    %37 = memref.load %arg10[%c0_23] : memref<1xf32, #tpu.memory_space<smem>>
    %38 = vector.broadcast %37 : f32 to vector<1x128xf32>
    %39 = arith.addf %36, %38 : vector<1x128xf32>
    %c0_24 = arith.constant 0 : index
    %c0_25 = arith.constant 0 : index
    %40 = vector.load %arg11[%c0_24, %c0_25] : memref<1x128xf32, #tpu.memory_space<vmem>>, vector<1x128xf32>
    tpu.vector_store %arg11[%c0_24, %c0_25], %39 {strides = array<i32>} : memref<1x128xf32, #tpu.memory_space<vmem>>, vector<1x128xf32>,
    return
  }
  func.func @transform_0(%arg0: i32) -> (i32, i32) {
    %c0_i32 = arith.constant 0 : i32
    %c0_i32_0 = arith.constant 0 : i32
    return %arg0, %c0_i32 : i32, i32
  }
  func.func @transform_1(%arg0: i32) -> (i32, i32) {
    %c0_i32 = arith.constant 0 : i32
    %c0_i32_0 = arith.constant 0 : i32
    %c0_i32_1 = arith.constant 0 : i32
    return %c0_i32, %c0_i32_0 : i32, i32
  }
  func.func @transform_2(%arg0: i32) -> (i32, i32) {
    %c0_i32 = arith.constant 0 : i32
    %c0_i32_0 = arith.constant 0 : i32
    %c0_i32_1 = arith.constant 0 : i32
    return %c0_i32, %c0_i32_0 : i32, i32
  }
  func.func @transform_3(%arg0: i32) -> (i32, i32) {
    %c0_i32 = arith.constant 0 : i32
    %c0_i32_0 = arith.constant 0 : i32
    %c0_i32_1 = arith.constant 0 : i32
    return %c0_i32, %c0_i32_0 : i32, i32
  }
  func.func @transform_4(%arg0: i32) -> (i32, i32) {
    %c0_i32 = arith.constant 0 : i32
    %c0_i32_0 = arith.constant 0 : i32
    %c0_i32_1 = arith.constant 0 : i32
    return %c0_i32, %c0_i32_0 : i32, i32
  }
  func.func @transform_5(%arg0: i32) -> (i32, i32) {
    %c0_i32 = arith.constant 0 : i32
    %c0_i32_0 = arith.constant 0 : i32
    %c0_i32_1 = arith.constant 0 : i32
    return %c0_i32, %c0_i32_0 : i32, i32
  }
  func.func @transform_6(%arg0: i32) -> (i32, i32) {
    %c0_i32 = arith.constant 0 : i32
    %c0_i32_0 = arith.constant 0 : i32
    %c0_i32_1 = arith.constant 0 : i32
    return %c0_i32, %c0_i32_0 : i32, i32
  }
  func.func @transform_7(%arg0: i32) -> (i32, i32) {
    %c0_i32 = arith.constant 0 : i32
    %c0_i32_0 = arith.constant 0 : i32
    %c0_i32_1 = arith.constant 0 : i32
    return %c0_i32, %c0_i32_0 : i32, i32
  }
  func.func @transform_8(%arg0: i32) -> (i32, i32) {
    %c0_i32 = arith.constant 0 : i32
    %c0_i32_0 = arith.constant 0 : i32
    %c0_i32_1 = arith.constant 0 : i32
    return %c0_i32, %c0_i32_0 : i32, i32
  }
  func.func @transform_9(%arg0: i32) -> i32 {
    %c0_i32 = arith.constant 0 : i32
    %c0_i32_0 = arith.constant 0 : i32
    return %c0_i32 : i32
  }
  func.func @transform_10(%arg0: i32) -> (i32, i32) {
    %c0_i32 = arith.constant 0 : i32
    %c0_i32_0 = arith.constant 0 : i32
    return %arg0, %c0_i32 : i32, i32
  }
}

</mosaic_0001>

<bundles_post_ra>
// kernel: tpu_custom_call.1
= control target key start
LH: loop header
LB: loop body
LE: loop exit
PB: predicated region body
PF: predicated region fallthrough
CT: control target
= control target key end

     0   :  { %v995_v2 = vmov 0   ;;  %vm129_vm0 = vcmask 1041408   ;;  %vm104_vm1 = vcmask 293888   ;;  %s1373_s0 = inlined_call_operand.vmem [shape: f32[128,36], index: 0, kind: input, shape index: {}]   ;;  %s1374_s1 = inlined_call_operand.vmem [shape: bf16[36,256], index: 1, kind: input, shape index: {}]   ;;  %s1375_s2 = inlined_call_operand.vmem [shape: f32[1,256], index: 2, kind: input, shape index: {}]   ;;  %s1376_s3 = inlined_call_operand.vmem [shape: bf16[128,128], index: 3, kind: input, shape index: {}]   ;;  %s1377_s4 = inlined_call_operand.vmem [shape: f32[1,128], index: 4, kind: input, shape index: {}]   ;;  %s1378_s5 = inlined_call_operand.vmem [shape: bf16[128,128], index: 5, kind: input, shape index: {}]   ;;  %s1379_s6 = inlined_call_operand.vmem [shape: f32[1,128], index: 6, kind: input, shape index: {}]   ;;  %s1380_s7 = inlined_call_operand.vmem [shape: f32[1,128], index: 7, kind: input, shape index: {}]   ;;  %s1381_s8 = inlined_call_operand.vmem [shape: f32[1,128], index: 8, kind: input, shape index: {}]   ;;  %s1382_s9 = inlined_call_operand.<no memory space> [shape: f32[1], index: 9, kind: input, shape index: {}]   ;;  %s1383_s10 = inlined_call_operand.hbm [shape: f32[1,128], index: 10, kind: output, shape index: {}]  }
   0x1   :  { %v947_v0 = vld [vmem:[%s1374_s1 + $0x4] ss:$8 sps:$4 sm:$0xff]   ;;  %v949_v1 = vld [vmem:[%s1374_s1] ss:$8 sps:$4 sm:$0xff]   ;;  %168 = vmatprep.mubr.bf16.mxu0 %v995_v2  ;;  %v950_v3 = vld [vmem:[%s1374_s1 + $0x14] ss:$8 sps:$4 sm:$0xff]  }
   0x2   :  { %136 = vmatprep.subr.bf16.mxu0 %v947_v0  ;;  %v66_v4 = vld [vmem:[%s1374_s1 + $0x20] sm:$0x33]  ;;  %v952_v5 = vld [vmem:[%s1374_s1 + $0x10] ss:$8 sps:$4 sm:$0xff]   ;;  %v39_v9 = vld [vmem:[%s1373_s0 + $0x8] sm:$0xff] }
   0x3   :  { %137 = vmatpush1.bf16.msra.mxu0 %v949_v1  ;;  %v803_v6 = vcombine.high %v66_v4, %v66_v4  ;;  %v802_v7 = vcombine.low %v66_v4, %v66_v4  ;;  %v38_v8 = vld [vmem:[%s1373_s0] sm:$0xff]  ;;  %v956_v13 = vld [vmem:[%s1376_s3 + $0x8] sm:$0xff]   ;;  %v957_v14 = vld [vmem:[%s1376_s3 + $0x10] sm:$0xff]  }
   0x4   :  { %138 = vmatprep.subr.bf16.mxu0 %v950_v3  ;;  %v955_v11 = vld [vmem:[%s1376_s3] sm:$0xff]   ;;  %v54_v12 = vpack.c.bf16 %v39_v9, %v38_v8  ;;  %v40_v15 = vld [vmem:[%s1373_s0 + $0x10] sm:$0xff]  ;;  %v41_v16 = vld [vmem:[%s1373_s0 + $0x18] sm:$0xff] }
   0x5   :  { %v131_v10 = vsel %vm129_vm0, %v802_v7, 0  ;;  %865 = vmatprep.subr.bf16.mxu1 %v955_v11  ;;  %v958_v17 = vld [vmem:[%s1376_s3 + $0x18] sm:$0xff]   ;;  %v55_v18 = vpack.c.bf16 %v41_v16, %v40_v15 }
   0x6   :  { %866 = vmatpush3.bf16.msra.mxu1 %v955_v11 }
   0x7   :  { %139 = vmatpush1.bf16.msra.mxu0 %v952_v5  ;;  %867 = vmatprep.subr.bf16.mxu1 %v956_v13 }
   0x8   :  { %804 = vmatprep.subr.msk.bf16.mxu0 %vm129_vm0, %v803_v6 }
   0xa   :  { %868 = vmatpush3.bf16.msra.mxu1 %v956_v13 }
   0xb   :  { %141 = vmatpush1.bf16.msra.mxu0 %v131_v10  ;;  %869 = vmatprep.subr.bf16.mxu1 %v957_v14 }
   0xe   :  { %805 = vmatmul.mubr.msk.bf16.vlgmr.msra.gmra.mrb[0].mxu0 %vm104_vm1, %v54_v12  ;;  %870 = vmatpush3.bf16.msra.mxu1 %v957_v14 }
   0xf   :  { %178 = vmatprep.mubr.bf16.mxu0 %v995_v2 }
  0x10   :  { %16 = vsyncpa [#allocation4], 0  ;;  %871 = vmatprep.subr.bf16.mxu1 %v958_v17  ;;  %v42_v19 = vld [vmem:[%s1373_s0 + $0x20] sm:$0xff]  ;;  %v43_v20 = vld [vmem:[%s1373_s0 + $0x28] sm:$0xff]  ;;  %v69_v48 = vlaneseq  ;;  %s996_s27 = smov [#allocation3]  }
  0x11   :  { %v56_v21 = vpack.c.bf16 %v43_v20, %v42_v19  ;;  %v44_v22 = vld [vmem:[%s1373_s0 + $0x30] sm:$0xff]  ;;  %v45_v23 = vld [vmem:[%s1373_s0 + $0x38] sm:$0xff]  ;;  %v46_v25 = vld [vmem:[%s1373_s0 + $0x40] sm:$0xff]  ;;  %s790_s28 = sshll.u32 %s996_s27, 4  ;;  %s791_s28 = int_to_ptr.vmem [resolvable:$true] %s790_s28 }
  0x12   :  { %872 = vmatpush3.bf16.msra.mxu1 %v958_v17  ;;  %v57_v24 = vpack.c.bf16 %v45_v23, %v44_v22  ;;  %v47_v26 = vld [vmem:[%s1373_s0 + $0x48] sm:$0xff]  ;;  %v48_v28 = vld [vmem:[%s1373_s0 + $0x50] sm:$0xff]  ;;  %v49_v29 = vld [vmem:[%s1373_s0 + $0x58] sm:$0xff]  ;;  %v1188_v49 = vshrl.u32 %v69_v48, 7  ;;  %s971_s1 = scalar_lea.vmem %s791_s28, 16  ;;  %s975_s29 = scalar_lea.vmem %s791_s28, 32 }
  0x13   :  { %v58_v27 = vpack.c.bf16 %v47_v26, %v46_v25  ;;  %v59_v30 = vpack.c.bf16 %v49_v29, %v48_v28  ;;  %v50_v31 = vld [vmem:[%s1373_s0 + $0x60] sm:$0xff]  ;;  %v51_v32 = vld [vmem:[%s1373_s0 + $0x68] sm:$0xff]  ;;  %v52_v34 = vld [vmem:[%s1373_s0 + $0x70] sm:$0xff]  ;;  %p972_p0 = scmp.ne.s32.totalorder %s791_s28, %s971_s1  ;;  %p976_p1 = scmp.lt.s32.totalorder %s791_s28, %s791_s28 }
  0x14   :  { %v60_v33 = vpack.c.bf16 %v51_v32, %v50_v31  ;;  %v53_v35 = vld [vmem:[%s1373_s0 + $0x78] sm:$0xff]  ;;  %v959_v37 = vld [vmem:[%s1376_s3 + $0x20] sm:$0xff]   ;;  %v960_v38 = vld [vmem:[%s1376_s3 + $0x28] sm:$0xff]   ;;  %v71_v50 = vsub.s32 0, %v1188_v49  ;;  %p977_p2 = scmp.lt.s32.totalorder %s975_s29, %s971_s1 }
  0x15   :  { %v61_v36 = vpack.c.bf16 %v53_v35, %v52_v34  ;;  %873 = vmatprep.subr.bf16.mxu1 %v959_v37  ;;  %v961_v39 = vld [vmem:[%s1376_s3 + $0x30] sm:$0xff]   ;;  %v962_v40 = vld [vmem:[%s1376_s3 + $0x38] sm:$0xff]   ;;  %v963_v41 = vld [vmem:[%s1378_s5] sm:$0xff]  }
  0x16   :  { %806 = vmatmul.mubr.msk.bf16.gmra.mrb[4].mxu0 %vm104_vm1, %v55_v18  ;;  %874 = vmatpush3.bf16.msra.mxu1 %v959_v37  ;;  %v964_v42 = vld [vmem:[%s1378_s5 + $0x8] sm:$0xff]   ;;  %v965_v43 = vld [vmem:[%s1378_s5 + $0x10] sm:$0xff]   ;;  %v966_v44 = vld [vmem:[%s1378_s5 + $0x18] sm:$0xff]   ;;  %p978_p3 = por %p977_p2, %p976_p1 }
  0x17   :  { %188 = vmatprep.mubr.bf16.mxu0 %v995_v2  ;;  %875 = vmatprep.subr.bf16.mxu1 %v960_v38  ;;  %v1170_v45 = vld [vmem:[%s1378_s5 + $0x20] sm:$0xff]   ;;  %v1176_v46 = vld [vmem:[%s1378_s5 + $0x28] sm:$0xff]   ;;  %v1183_v47 = vld [vmem:[%s1378_s5 + $0x30] sm:$0xff]  }
  0x18   :  { %897 = vmatprep.subr.bf16.mxu0 %v963_v41  ;;  %v1194_v51 = vld [vmem:[%s1375_s2] sm:$0x3]  ;;  %p979_p4 = pnand %p978_p3, %p972_p0 }
  0x19   :  { %898 = vmatpush3.bf16.msra.mxu0 %v963_v41  ;;  %v1197_v52 = vrot.slane %v1194_v51, %v71_v50 }
  0x1a   :  { %876 = vmatpush3.bf16.msra.mxu1 %v960_v38  ;;  %899 = vmatprep.subr.bf16.mxu0 %v964_v42 }
  0x1b   :  { %877 = vmatprep.subr.bf16.mxu1 %v961_v39 }
  0x1d   :  { %900 = vmatpush3.bf16.msra.mxu0 %v964_v42 }
  0x1e   :  { %807 = vmatmul.mubr.msk.bf16.gmra.mrb[8].mxu0 %vm104_vm1, %v56_v21  ;;  %878 = vmatpush3.bf16.msra.mxu1 %v961_v39 }
  0x1f   :  { %198 = vmatprep.mubr.bf16.mxu0 %v995_v2  ;;  %879 = vmatprep.subr.bf16.mxu1 %v962_v40 }
  0x20   :  { %901 = vmatprep.subr.bf16.mxu0 %v965_v43 }
  0x21   :  { %902 = vmatpush3.bf16.msra.mxu0 %v965_v43 }
  0x22   :  { %880 = vmatpush3.bf16.msra.mxu1 %v962_v40  ;;  %903 = vmatprep.subr.bf16.mxu0 %v966_v44 }
  0x23   :  { %929 = vmatprep.subr.bf16.mxu1 %v963_v41 }
  0x25   :  { %904 = vmatpush3.bf16.msra.mxu0 %v966_v44 }
  0x26   :  { %808 = vmatmul.mubr.msk.bf16.gmra.mrb[12].mxu0 %vm104_vm1, %v57_v24  ;;  %905 = vmatprep.subr.bf16.mxu0 %v1170_v45 }
  0x27   :  { %208 = vmatprep.mubr.bf16.mxu0 %v995_v2 }
  0x29   :  { %906 = vmatpush3.bf16.msra.mxu0 %v1170_v45 }
  0x2a   :  { %907 = vmatprep.subr.bf16.mxu0 %v1176_v46 }
  0x2d   :  { %908 = vmatpush3.bf16.msra.mxu0 %v1176_v46 }
  0x2e   :  { %809 = vmatmul.mubr.msk.bf16.gmra.mrb[16].mxu0 %vm104_vm1, %v58_v27  ;;  %909 = vmatprep.subr.bf16.mxu0 %v1183_v47 }
  0x2f   :  { %218 = vmatprep.mubr.bf16.mxu0 %v995_v2 }
  0x31   :  { %910 = vmatpush3.bf16.msra.mxu0 %v1183_v47 }
  0x36   :  { %810 = vmatmul.mubr.msk.bf16.gmra.mrb[20].mxu0 %vm104_vm1, %v59_v30 }
  0x37   :  { %228 = vmatprep.mubr.bf16.mxu0 %v995_v2 }
  0x3e   :  { %811 = vmatmul.mubr.msk.bf16.gmra.mrb[24].mxu0 %vm104_vm1, %v60_v33 }
  0x3f   :  { %238 = vmatprep.mubr.bf16.mxu0 %v995_v2 }
  0x46   :  { %812 = vmatmul.mubr.msk.bf16.gmra.mrb[28].mxu0 %vm104_vm1, %v61_v36 }
  0xe1   :  { %v170_v53 = vpop.f32.mrb[0].mxu0 }
  0xe2   :  { %v171_v54 = vadd.f32 %v170_v53, %v1197_v52  ;;  %v1200_v55 = vpop.f32.mrb[1].mxu0 }
  0xe3   :  { %v174_v56 = vpop.f32.mrb[2].mxu0 }
  0xe4   :  { %v175_v57 = vadd.f32 %v174_v56, %v1197_v52  ;;  %v1203_v58 = vpop.f32.mrb[3].mxu0  ;;  %v249_v59 = vmax.f32 %v171_v54, 0.0 }
  0xe6   :  { %v251_v60 = vmax.f32 %v175_v57, 0.0 }
  0xe8   :  { %v281_v61 = vpack.c.bf16 %v251_v60, %v249_v59 }
  0xe9   :  { %v180_v62 = vpop.f32.mrb[4].mxu0 }
  0xea   :  { %v181_v63 = vadd.f32 %v180_v62, %v1197_v52  ;;  %v1206_v0 = vpop.f32.mrb[5].mxu0  ;;  %881 = vmatprep.mubr.bf16.mxu1 %v281_v61 }
  0xeb   :  { %v184_v1 = vpop.f32.mrb[6].mxu0 }
  0xec   :  { %v185_v2 = vadd.f32 %v184_v1, %v1197_v52  ;;  %v1209_v3 = vpop.f32.mrb[7].mxu0  ;;  %v253_v4 = vmax.f32 %v181_v63, 0.0 }
  0xee   :  { %v255_v5 = vmax.f32 %v185_v2, 0.0 }
  0xf0   :  { %v282_v6 = vpack.c.bf16 %v255_v5, %v253_v4  ;;  %v970_v4 = vld [vmem:[%s1378_s5 + $0x38] sm:$0xff]   ;;  %v813_v5 = vld [vmem:[%s1377_s4] ss:$0 sm:$0xff] }
  0xf1   :  { %v190_v7 = vpop.f32.mrb[8].mxu0  ;;  %911 = vmatprep.subr.bf16.mxu0 %v970_v4 }
  0xf2   :  { %v191_v8 = vadd.f32 %v190_v7, %v1197_v52  ;;  %v1212_v9 = vpop.f32.mrb[9].mxu0  ;;  %882 = vmatmul.mubr.bf16.vlgmr.msra.gmra.mrb[0].mxu1 %v282_v6  ;;  %912 = vmatpush3.bf16.msra.mxu0 %v970_v4 }
  0xf3   :  { %v194_v10 = vpop.f32.mrb[10].mxu0  ;;  %937 = vmatpush3.bf16.msra.mxu1 %v963_v41 }
  0xf4   :  { %v195_v11 = vadd.f32 %v194_v10, %v1197_v52  ;;  %v1215_v12 = vpop.f32.mrb[11].mxu0  ;;  %930 = vmatprep.subr.bf16.mxu1 %v964_v42  ;;  %v257_v13 = vmax.f32 %v191_v8, 0.0 }
  0xf6   :  { %v259_v14 = vmax.f32 %v195_v11, 0.0 }
  0xf7   :  { %938 = vmatpush3.bf16.msra.mxu1 %v964_v42 }
  0xf8   :  { %v283_v15 = vpack.c.bf16 %v259_v14, %v257_v13  ;;  %931 = vmatprep.subr.bf16.mxu1 %v965_v43 }
  0xf9   :  { %v200_v16 = vpop.f32.mrb[12].mxu0 }
  0xfa   :  { %v201_v17 = vadd.f32 %v200_v16, %v1197_v52  ;;  %v1218_v18 = vpop.f32.mrb[13].mxu0  ;;  %885 = vmatprep.mubr.bf16.mxu1 %v283_v15 }
  0xfb   :  { %v204_v19 = vpop.f32.mrb[14].mxu0  ;;  %939 = vmatpush3.bf16.msra.mxu1 %v965_v43 }
  0xfc   :  { %v205_v20 = vadd.f32 %v204_v19, %v1197_v52  ;;  %v1221_v21 = vpop.f32.mrb[15].mxu0  ;;  %932 = vmatprep.subr.bf16.mxu1 %v966_v44  ;;  %v261_v22 = vmax.f32 %v201_v17, 0.0 }
  0xfe   :  { %v263_v23 = vmax.f32 %v205_v20, 0.0 }
  0xff   :  { %940 = vmatpush3.bf16.msra.mxu1 %v966_v44 }
 0x100   :  { %v284_v24 = vpack.c.bf16 %v263_v23, %v261_v22  ;;  %933 = vmatprep.subr.bf16.mxu1 %v1170_v45 }
 0x101   :  { %v210_v25 = vpop.f32.mrb[16].mxu0 }
 0x102   :  { %v211_v26 = vadd.f32 %v210_v25, %v1197_v52  ;;  %v1225_v27 = vpop.f32.mrb[17].mxu0  ;;  %886 = vmatmul.mubr.bf16.gmra.mrb[4].mxu1 %v284_v24 }
 0x103   :  { %v214_v28 = vpop.f32.mrb[18].mxu0  ;;  %941 = vmatpush3.bf16.msra.mxu1 %v1170_v45 }
 0x104   :  { %v215_v29 = vadd.f32 %v214_v28, %v1197_v52  ;;  %v1229_v30 = vpop.f32.mrb[19].mxu0  ;;  %934 = vmatprep.subr.bf16.mxu1 %v1176_v46  ;;  %v265_v31 = vmax.f32 %v211_v26, 0.0 }
 0x106   :  { %v267_v32 = vmax.f32 %v215_v29, 0.0 }
 0x107   :  { %942 = vmatpush3.bf16.msra.mxu1 %v1176_v46 }
 0x108   :  { %v285_v33 = vpack.c.bf16 %v267_v32, %v265_v31  ;;  %935 = vmatprep.subr.bf16.mxu1 %v1183_v47 }
 0x109   :  { %v220_v34 = vpop.f32.mrb[20].mxu0 }
 0x10a   :  { %v221_v35 = vadd.f32 %v220_v34, %v1197_v52  ;;  %v1235_v36 = vpop.f32.mrb[21].mxu0  ;;  %889 = vmatprep.mubr.bf16.mxu1 %v285_v33 }
 0x10b   :  { %v224_v37 = vpop.f32.mrb[22].mxu0  ;;  %943 = vmatpush3.bf16.msra.mxu1 %v1183_v47 }
 0x10c   :  { %v225_v38 = vadd.f32 %v224_v37, %v1197_v52  ;;  %v1239_v39 = vpop.f32.mrb[23].mxu0  ;;  %v269_v40 = vmax.f32 %v221_v35, 0.0  ;;  %936 = vmatprep.subr.bf16.mxu1 %v970_v4 }
 0x10e   :  { %v271_v41 = vmax.f32 %v225_v38, 0.0 }
 0x10f   :  { %944 = vmatpush3.bf16.msra.mxu1 %v970_v4 }
 0x110   :  { %v286_v42 = vpack.c.bf16 %v271_v41, %v269_v40 }
 0x111   :  { %v230_v43 = vpop.f32.mrb[24].mxu0 }
 0x112   :  { %v231_v44 = vadd.f32 %v230_v43, %v1197_v52  ;;  %v1242_v45 = vpop.f32.mrb[25].mxu0  ;;  %890 = vmatmul.mubr.bf16.gmra.mrb[8].mxu1 %v286_v42 }
 0x113   :  { %v234_v46 = vpop.f32.mrb[26].mxu0 }
 0x114   :  { %v235_v48 = vadd.f32 %v234_v46, %v1197_v52  ;;  %v1245_v50 = vpop.f32.mrb[27].mxu0  ;;  %v273_v53 = vmax.f32 %v231_v44, 0.0 }
 0x116   :  { %v275_v47 = vmax.f32 %v235_v48, 0.0 }
 0x118   :  { %v287_v54 = vpack.c.bf16 %v275_v47, %v273_v53 }
 0x119   :  { %v240_v56 = vpop.f32.mrb[28].mxu0 }
 0x11a   :  { %v241_v57 = vadd.f32 %v240_v56, %v1197_v52  ;;  %v1248_v59 = vpop.f32.mrb[29].mxu0  ;;  %893 = vmatprep.mubr.bf16.mxu1 %v287_v54 }
 0x11b   :  { %v244_v60 = vpop.f32.mrb[30].mxu0 }
 0x11c   :  { %v245_v61 = vadd.f32 %v244_v60, %v1197_v52  ;;  %v1251_v62 = vpop.f32.mrb[31].mxu0  ;;  %v277_v63 = vmax.f32 %v241_v57, 0.0 }
 0x11e   :  { %v279_v1 = vmax.f32 %v245_v61, 0.0 }
 0x120   :  { %v288_v2 = vpack.c.bf16 %v279_v1, %v277_v63 }
 0x122   :  { %894 = vmatmul.mubr.bf16.gmra.mrb[12].mxu1 %v288_v2 }
 0x1c5   :  { %v883_v6 = vpop.f32.mrb[0].mxu1 }
 0x1c6   :  { %v403_v52 = vadd.f32 %v883_v6, %v813_v5  ;;  %v394_v7 = vpop.f32.mrb[1].mxu1 }
 0x1c7   :  { %v395_v8 = vadd.f32 %v813_v5, %v394_v7  ;;  %v884_v10 = vpop.f32.mrb[2].mxu1 }
 0x1c8   :  { %v406_v11 = vadd.f32 %v884_v10, %v813_v5  ;;  %v397_v13 = vpop.f32.mrb[3].mxu1  ;;  %v459_v15 = vmax.f32 %v403_v52, 0.0 }
 0x1c9   :  { %v398_v14 = vadd.f32 %v813_v5, %v397_v13  ;;  %v457_v17 = vmax.f32 %v395_v8, 0.0 }
 0x1ca   :  { %v460_v16 = vmax.f32 %v406_v11, 0.0 }
 0x1cb   :  { %v458_v19 = vmax.f32 %v398_v14, 0.0 }
 0x1cc   :  { %v474_v20 = vpack.c.bf16 %v460_v16, %v459_v15 }
 0x1cd   :  { %v473_v22 = vpack.c.bf16 %v458_v19, %v457_v17  ;;  %v75_v19 = vsub.s32 1, %v1188_v49 }
 0x1cf   :  { %913 = vmatprep.mubr.bf16.mxu0 %v473_v22 }
 0x1d0   :  { %914 = vmatmul.mubr.bf16.vlgmr.msra.gmra.mrb[32].mxu0 %v474_v20  ;;  %v1261_v20 = vrot.slane %v1194_v51, %v75_v19 }
 0x1d2   :  { %v183_v22 = vadd.f32 %v1206_v0, %v1261_v20  ;;  %v177_v49 = vadd.f32 %v1203_v58, %v1261_v20 }
 0x1d4   :  { %v254_v51 = vmax.f32 %v183_v22, 0.0 }
 0x1d5   :  { %v887_v23 = vpop.f32.mrb[4].mxu1 }
 0x1d6   :  { %v419_v24 = vadd.f32 %v887_v23, %v813_v5  ;;  %v410_v25 = vpop.f32.mrb[5].mxu1  ;;  %v173_v23 = vadd.f32 %v1200_v55, %v1261_v20  ;;  %v1280_v55 = vld [vmem:[%s1380_s7] ss:$0 sm:$0xff] }
 0x1d7   :  { %v411_v26 = vadd.f32 %v813_v5, %v410_v25  ;;  %v888_v28 = vpop.f32.mrb[6].mxu1 }
 0x1d8   :  { %v422_v29 = vadd.f32 %v888_v28, %v813_v5  ;;  %v413_v31 = vpop.f32.mrb[7].mxu1  ;;  %v463_v33 = vmax.f32 %v419_v24, 0.0  ;;  %v187_v24 = vadd.f32 %v1209_v3, %v1261_v20  ;;  %v250_v0 = vmax.f32 %v173_v23, 0.0  ;;  %v1286_v3 = vld [vmem:[%s1381_s8] ss:$0 sm:$0xff] }
 0x1d9   :  { %v414_v32 = vadd.f32 %v813_v5, %v413_v31  ;;  %v461_v35 = vmax.f32 %v411_v26, 0.0 }
 0x1da   :  { %v464_v34 = vmax.f32 %v422_v29, 0.0  ;;  %v256_v58 = vmax.f32 %v187_v24, 0.0 }
 0x1db   :  { %v462_v37 = vmax.f32 %v414_v32, 0.0 }
 0x1dc   :  { %v476_v38 = vpack.c.bf16 %v464_v34, %v463_v33 }
 0x1dd   :  { %v475_v40 = vpack.c.bf16 %v462_v37, %v461_v35  ;;  %v252_v35 = vmax.f32 %v177_v49, 0.0 }
 0x1df   :  { %917 = vmatprep.mubr.bf16.mxu1 %v475_v40  ;;  %v697_v40 = vmul.f32 %v1286_v3, %v254_v51 }
 0x1e0   :  { %918 = vmatmul.mubr.bf16.vlgmr.msra.gmra.mrb[16].mxu1 %v476_v38 }
 0x1e5   :  { %v891_v41 = vpop.f32.mrb[8].mxu1 }
 0x1e6   :  { %v435_v42 = vadd.f32 %v891_v41, %v813_v5  ;;  %v426_v43 = vpop.f32.mrb[9].mxu1 }
 0x1e7   :  { %v427_v44 = vadd.f32 %v813_v5, %v426_v43  ;;  %v892_v46 = vpop.f32.mrb[10].mxu1 }
 0x1e8   :  { %v438_v48 = vadd.f32 %v892_v46, %v813_v5  ;;  %v429_v53 = vpop.f32.mrb[11].mxu1  ;;  %v467_v54 = vmax.f32 %v435_v42, 0.0  ;;  %v695_v46 = vmul.f32 %v1286_v3, %v250_v0 }
 0x1e9   :  { %v430_v47 = vadd.f32 %v813_v5, %v429_v53  ;;  %v465_v57 = vmax.f32 %v427_v44, 0.0 }
 0x1ea   :  { %v468_v56 = vmax.f32 %v438_v48, 0.0  ;;  %v698_v48 = vmul.f32 %v1286_v3, %v256_v58 }
 0x1eb   :  { %v466_v60 = vmax.f32 %v430_v47, 0.0 }
 0x1ec   :  { %v478_v61 = vpack.c.bf16 %v468_v56, %v467_v54  ;;  %v696_v54 = vmul.f32 %v1286_v3, %v252_v35  ;;  %v217_v35 = vadd.f32 %v1229_v30, %v1261_v20 }
 0x1ed   :  { %v477_v63 = vpack.c.bf16 %v466_v60, %v465_v57 }
 0x1ef   :  { %921 = vmatprep.mubr.bf16.mxu1 %v477_v63  ;;  %v203_v63 = vadd.f32 %v1218_v18, %v1261_v20 }
 0x1f0   :  { %922 = vmatmul.mubr.bf16.gmra.mrb[20].mxu1 %v478_v61 }
 0x1f5   :  { %v895_v1 = vpop.f32.mrb[12].mxu1 }
 0x1f6   :  { %v451_v2 = vadd.f32 %v895_v1, %v813_v5  ;;  %v442_v4 = vpop.f32.mrb[13].mxu1  ;;  %v193_v1 = vadd.f32 %v1212_v9, %v1261_v20 }
 0x1f7   :  { %v443_v6 = vadd.f32 %v813_v5, %v442_v4  ;;  %v896_v52 = vpop.f32.mrb[14].mxu1  ;;  %v197_v4 = vadd.f32 %v1215_v12, %v1261_v20 }
 0x1f8   :  { %v454_v7 = vadd.f32 %v896_v52, %v813_v5  ;;  %v445_v8 = vpop.f32.mrb[15].mxu1  ;;  %v471_v11 = vmax.f32 %v451_v2, 0.0  ;;  %v207_v2 = vadd.f32 %v1221_v21, %v1261_v20  ;;  %v262_v52 = vmax.f32 %v203_v63, 0.0 }
 0x1f9   :  { %v446_v10 = vadd.f32 %v813_v5, %v445_v8  ;;  %v469_v14 = vmax.f32 %v443_v6, 0.0  ;;  %v1270_v5 = vld [vmem:[%s1379_s6] ss:$0 sm:$0xff] }
 0x1fa   :  { %v472_v13 = vmax.f32 %v454_v7, 0.0  ;;  %v264_v18 = vmax.f32 %v207_v2, 0.0  ;;  %v701_v12 = vmul.f32 %v1286_v3, %v262_v52 }
 0x1fb   :  { %v470_v15 = vmax.f32 %v446_v10, 0.0  ;;  %v258_v10 = vmax.f32 %v193_v1, 0.0 }
 0x1fc   :  { %v480_v16 = vpack.c.bf16 %v472_v13, %v471_v11 }
 0x1fd   :  { %v479_v17 = vpack.c.bf16 %v470_v15, %v469_v14  ;;  %v699_v23 = vmul.f32 %v1286_v3, %v258_v10  ;;  %v243_v10 = vadd.f32 %v1248_v59, %v1261_v20 }
 0x1ff   :  { %925 = vmatprep.mubr.bf16.mxu1 %v479_v17 }
 0x200   :  { %926 = vmatmul.mubr.bf16.gmra.mrb[24].mxu1 %v480_v16  ;;  %v260_v16 = vmax.f32 %v197_v4, 0.0 }
 0x2a3   :  { %v915_v25 = vpop.f32.mrb[32].mxu0 }
 0x2a4   :  { %v595_v26 = vadd.f32 %v915_v25, %v1270_v5  ;;  %v586_v28 = vpop.f32.mrb[33].mxu0  ;;  %v702_v25 = vmul.f32 %v1286_v3, %v264_v18  ;;  %v237_v18 = vadd.f32 %v1245_v50, %v1261_v20 }
 0x2a5   :  { %v587_v29 = vadd.f32 %v1270_v5, %v586_v28  ;;  %v916_v31 = vpop.f32.mrb[34].mxu0  ;;  %v700_v28 = vmul.f32 %v1286_v3, %v260_v16 }
 0x2a6   :  { %v651_v32 = vmax.f32 %v595_v26, 0.0  ;;  %v598_v33 = vadd.f32 %v916_v31, %v1270_v5  ;;  %v589_v34 = vpop.f32.mrb[35].mxu0 }
 0x2a7   :  { %v649_v37 = vmax.f32 %v587_v29, 0.0  ;;  %v590_v38 = vadd.f32 %v1270_v5, %v589_v34  ;;  %v227_v34 = vadd.f32 %v1239_v39, %v1261_v20 }
 0x2a8   :  { %v674_v41 = vmul.f32 %v1280_v55, %v651_v32  ;;  %v652_v42 = vmax.f32 %v598_v33, 0.0  ;;  %v223_v32 = vadd.f32 %v1235_v36, %v1261_v20  ;;  %v213_v33 = vadd.f32 %v1225_v27, %v1261_v20 }
 0x2a9   :  { %v650_v43 = vmax.f32 %v590_v38, 0.0  ;;  %v672_v44 = vmul.f32 %v1280_v55, %v649_v37  ;;  %v272_v36 = vmax.f32 %v227_v34, 0.0 }
 0x2aa   :  { %v675_v53 = vmul.f32 %v1280_v55, %v652_v42  ;;  %v713_v47 = vadd.f32 %v697_v40, %v674_v41  ;;  %v270_v38 = vmax.f32 %v223_v32, 0.0  ;;  %v266_v42 = vmax.f32 %v213_v33, 0.0 }
 0x2ab   :  { %v673_v56 = vmul.f32 %v1280_v55, %v650_v43  ;;  %v711_v57 = vadd.f32 %v695_v46, %v672_v44  ;;  %v706_v63 = vmul.f32 %v1286_v3, %v272_v36 }
 0x2ac   :  { %v714_v60 = vadd.f32 %v698_v48, %v675_v53  ;;  %v268_v53 = vmax.f32 %v217_v35, 0.0  ;;  %v705_v30 = vmul.f32 %v1286_v3, %v270_v38 }
 0x2ad   :  { %727 = vxpose.xlu0.b32.start [1/16] %v711_v57, 128  ;;  %v712_v61 = vadd.f32 %v696_v54, %v673_v56  ;;  %v703_v57 = vmul.f32 %v1286_v3, %v266_v42 }
 0x2ae   :  { %v704_v4 = vmul.f32 %v1286_v3, %v268_v53 }
 0x2b1   :  { %728 = vxpose.xlu0.b32.cont [2/16] %v712_v61, 128 }
 0x2b3   :  { %v919_v6 = vpop.f32.mrb[16].mxu1 }
 0x2b4   :  { %v611_v7 = vadd.f32 %v919_v6, %v1270_v5  ;;  %v602_v8 = vpop.f32.mrb[17].mxu1 }
 0x2b5   :  { %v603_v11 = vadd.f32 %v1270_v5, %v602_v8  ;;  %v920_v13 = vpop.f32.mrb[18].mxu1  ;;  %729 = vxpose.xlu0.b32.cont [3/16] %v713_v47, 128 }
 0x2b6   :  { %v655_v14 = vmax.f32 %v611_v7, 0.0  ;;  %v614_v9 = vadd.f32 %v920_v13, %v1270_v5  ;;  %v605_v15 = vpop.f32.mrb[19].mxu1  ;;  %v247_v13 = vadd.f32 %v1251_v62, %v1261_v20 }
 0x2b7   :  { %v653_v21 = vmax.f32 %v603_v11, 0.0  ;;  %v606_v17 = vadd.f32 %v1270_v5, %v605_v15  ;;  %v233_v11 = vadd.f32 %v1242_v45, %v1261_v20 }
 0x2b8   :  { %v678_v19 = vmul.f32 %v1280_v55, %v655_v14  ;;  %v656_v22 = vmax.f32 %v614_v9, 0.0  ;;  %v278_v9 = vmax.f32 %v243_v10, 0.0  ;;  %v280_v59 = vmax.f32 %v247_v13, 0.0 }
 0x2b9   :  { %v676_v24 = vmul.f32 %v1280_v55, %v653_v21  ;;  %v654_v49 = vmax.f32 %v606_v17, 0.0  ;;  %730 = vxpose.xlu0.b32.cont [4/16] %v714_v60, 128  ;;  %v274_v21 = vmax.f32 %v233_v11, 0.0 }
 0x2ba   :  { %v679_v51 = vmul.f32 %v1280_v55, %v656_v22  ;;  %v717_v26 = vadd.f32 %v701_v12, %v678_v19  ;;  %v709_v50 = vmul.f32 %v1286_v3, %v278_v9 }
 0x2bb   :  { %v677_v0 = vmul.f32 %v1280_v55, %v654_v49  ;;  %v715_v29 = vadd.f32 %v699_v23, %v676_v24  ;;  %v276_v23 = vmax.f32 %v237_v18, 0.0 }
 0x2bc   :  { %v718_v31 = vadd.f32 %v702_v25, %v679_v51  ;;  %v707_v25 = vmul.f32 %v1286_v3, %v274_v21 }
 0x2bd   :  { %731 = vxpose.xlu0.b32.cont [5/16] %v715_v29, 128  ;;  %v716_v58 = vadd.f32 %v700_v28, %v677_v0  ;;  %v710_v28 = vmul.f32 %v1286_v3, %v280_v59 }
 0x2c1   :  { %732 = vxpose.xlu0.b32.cont [6/16] %v716_v58, 128 }
 0x2c3   :  { %v923_v37 = vpop.f32.mrb[20].mxu1 }
 0x2c4   :  { %v627_v40 = vadd.f32 %v923_v37, %v1270_v5  ;;  %v618_v41 = vpop.f32.mrb[21].mxu1 }
 0x2c5   :  { %v619_v43 = vadd.f32 %v1270_v5, %v618_v41  ;;  %v924_v44 = vpop.f32.mrb[22].mxu1  ;;  %733 = vxpose.xlu0.b32.cont [7/16] %v717_v26, 128 }
 0x2c6   :  { %v659_v46 = vmax.f32 %v627_v40, 0.0  ;;  %v630_v27 = vadd.f32 %v924_v44, %v1270_v5  ;;  %v621_v48 = vpop.f32.mrb[23].mxu1 }
 0x2c7   :  { %v657_v39 = vmax.f32 %v619_v43, 0.0  ;;  %v622_v47 = vadd.f32 %v1270_v5, %v621_v48 }
 0x2c8   :  { %v682_v54 = vmul.f32 %v1280_v55, %v659_v46  ;;  %v660_v56 = vmax.f32 %v630_v27, 0.0 }
 0x2c9   :  { %v680_v60 = vmul.f32 %v1280_v55, %v657_v39  ;;  %v658_v61 = vmax.f32 %v622_v47, 0.0  ;;  %734 = vxpose.xlu0.b32.cont [8/16] %v718_v31, 128  ;;  %v708_v31 = vmul.f32 %v1286_v3, %v276_v23 }
 0x2ca   :  { %v683_v1 = vmul.f32 %v1280_v55, %v660_v56  ;;  %v721_v2 = vadd.f32 %v705_v30, %v682_v54 }
 0x2cb   :  { %v681_v6 = vmul.f32 %v1280_v55, %v658_v61  ;;  %v719_v52 = vadd.f32 %v703_v57, %v680_v60 }
 0x2cc   :  { %v722_v7 = vadd.f32 %v706_v63, %v683_v1 }
 0x2cd   :  { %735 = vxpose.xlu0.b32.cont [9/16] %v719_v52, 128  ;;  %v720_v8 = vadd.f32 %v704_v4, %v681_v6 }
 0x2d1   :  { %736 = vxpose.xlu0.b32.cont [10/16] %v720_v8, 128 }
 0x2d3   :  { %v927_v14 = vpop.f32.mrb[24].mxu1 }
 0x2d4   :  { %v643_v15 = vadd.f32 %v927_v14, %v1270_v5  ;;  %v634_v16 = vpop.f32.mrb[25].mxu1  ;;  %v781_v14 = vstv %s1382_s9 }
 0x2d5   :  { %v635_v17 = vadd.f32 %v1270_v5, %v634_v16  ;;  %v928_v12 = vpop.f32.mrb[26].mxu1  ;;  %737 = vxpose.xlu0.b32.cont [11/16] %v721_v2, 128 }
 0x2d6   :  { %v663_v19 = vmax.f32 %v643_v15, 0.0  ;;  %v646_v45 = vadd.f32 %v928_v12, %v1270_v5  ;;  %v637_v22 = vpop.f32.mrb[27].mxu1 }
 0x2d7   :  { %v661_v62 = vmax.f32 %v635_v17, 0.0  ;;  %v638_v24 = vadd.f32 %v1270_v5, %v637_v22 }
 0x2d8   :  { %v686_v20 = vmul.f32 %v1280_v55, %v663_v19  ;;  %v664_v49 = vmax.f32 %v646_v45, 0.0 }
 0x2d9   :  { %v684_v51 = vmul.f32 %v1280_v55, %v661_v62  ;;  %v662_v26 = vmax.f32 %v638_v24, 0.0  ;;  %738 = vxpose.xlu0.b32.cont [12/16] %v722_v7, 128 }
 0x2da   :  { %v687_v0 = vmul.f32 %v1280_v55, %v664_v49  ;;  %v725_v29 = vadd.f32 %v709_v50, %v686_v20 }
 0x2db   :  { %v685_v5 = vmul.f32 %v1280_v55, %v662_v26  ;;  %v723_v58 = vadd.f32 %v707_v25, %v684_v51 }
 0x2dc   :  { %v726_v32 = vadd.f32 %v710_v28, %v687_v0 }
 0x2dd   :  { %739 = vxpose.xlu0.b32.cont [13/16] %v723_v58, 128  ;;  %v724_v33 = vadd.f32 %v708_v31, %v685_v5 }
 0x2e1   :  { %740 = vxpose.xlu0.b32.cont [14/16] %v724_v33, 128 }
 0x2e5   :  { %741 = vxpose.xlu0.b32.cont [15/16] %v725_v29, 128 }
 0x2e9   :  { %742 = vxpose.xlu0.b32.end [16/16] %v726_v32, 128 }
 0x32d   :  { %v743_v34 = vpop.trf.xlu0 }
 0x331   :  { %v744_v35 = vpop.trf.xlu0 }
 0x332   :  { %v759_v36 = vadd.f32 %v744_v35, %v743_v34 }
 0x335   :  { %v745_v37 = vpop.trf.xlu0 }
 0x336   :  { %v760_v3 = vadd.f32 %v759_v36, %v745_v37 }
 0x339   :  { %v746_v38 = vpop.trf.xlu0 }
 0x33a   :  { %v761_v55 = vadd.f32 %v760_v3, %v746_v38 }
 0x33d   :  { %v747_v40 = vpop.trf.xlu0 }
 0x33e   :  { %v762_v27 = vadd.f32 %v761_v55, %v747_v40 }
 0x341   :  { %v748_v41 = vpop.trf.xlu0 }
 0x342   :  { %v763_v53 = vadd.f32 %v762_v27, %v748_v41 }
 0x345   :  { %v749_v42 = vpop.trf.xlu0 }
 0x346   :  { %v764_v39 = vadd.f32 %v763_v53, %v749_v42 }
 0x349   :  { %v750_v43 = vpop.trf.xlu0 }
 0x34a   :  { %v765_v30 = vadd.f32 %v764_v39, %v750_v43 }
 0x34d   :  { %v751_v44 = vpop.trf.xlu0 }
 0x34e   :  { %v766_v54 = vadd.f32 %v765_v30, %v751_v44 }
 0x351   :  { %v752_v46 = vpop.trf.xlu0 }
 0x352   :  { %v767_v57 = vadd.f32 %v766_v54, %v752_v46 }
 0x355   :  { %v753_v48 = vpop.trf.xlu0 }
 0x356   :  { %v768_v60 = vadd.f32 %v767_v57, %v753_v48 }
 0x359   :  { %v754_v47 = vpop.trf.xlu0 }
 0x35a   :  { %v769_v63 = vadd.f32 %v768_v60, %v754_v47 }
 0x35d   :  { %v755_v56 = vpop.trf.xlu0 }
 0x35e   :  { %v770_v1 = vadd.f32 %v769_v63, %v755_v56 }
 0x361   :  { %v756_v61 = vpop.trf.xlu0 }
 0x362   :  { %v771_v4 = vadd.f32 %v770_v1, %v756_v61 }
 0x365   :  { %v757_v2 = vpop.trf.xlu0 }
 0x366   :  { %v772_v6 = vadd.f32 %v771_v4, %v757_v2 }
 0x369   :  { %v758_v52 = vpop.trf.xlu0 }
 0x36a   :  { %v773_v7 = vadd.f32 %v772_v6, %v758_v52 }
 0x36c   :  { %v774_v8 = vrot.slane %v773_v7, 4 }
 0x36e   :  { %v775_v10 = vadd.f32 %v774_v8, %v773_v7 }
 0x370   :  { %v776_v11 = vrot.slane %v775_v10, 2 }
 0x372   :  { %v777_v13 = vadd.f32 %v776_v11, %v775_v10 }
 0x374   :  { %v778_v18 = vrot.slane %v777_v13, 1 }
 0x376   :  { %v779_v9 = vadd.f32 %v778_v18, %v777_v13 }
 0x378   :  { %v782_v15 = vadd.f32 %v781_v14, %v779_v9 }
 0x37a   :  { %783 = vst [vmem:[#allocation3] sm:$0x1] %v782_v15 }
 0x37b   :  { %982 = shalt.err (!%p979_p4)
}
 0x37c   :  { %s983_s12 = scalar_lea.hbm %s1383_s10, 16 }
 0x37d   :  { %p984_p5 = scmp.ne.s32.totalorder %s1383_s10, %s983_s12  ;;  %p987_p6 = scmp.lt.u32.totalorder %s983_s12, %s1383_s10 }
 0x37f   :  { %p989_p7 = pnand %p987_p6, %p984_p5 }
 0x381   :  { %992 = shalt.err (!%p989_p7)
}
 0x382   :  { %793 = dma.vmem_to_hbm [thread:$0]  %s791_s28, 16, %s1383_s10, [#allocation4]  }
 0x383   :  { %993 = dma.done.wait [#allocation4], 16  }
 0x384   :  { %994 = vsyncadd [#allocation4], 4294967280 }
 0x385   :  { %797 = vsyncpa [#allocation4], 1 }

</bundles_post_ra>
